<compile_context>
chip_gen: v6e
topology: v6e:2x2x1
jax: 0.10.0
libtpu: 0.0.40
codegen_flags: <defaults>
</compile_context>

<pallas_src>
import functools

import numpy as np
import jax
import jax.numpy as jnp
from jax.experimental import pallas as pl
from jax.experimental.pallas import tpu as pltpu


_ONEHOT_CHUNK = 1024              # node-axis chunk for the one-hot MXU gather
_NBUF = 4                         # manual DMA pipeline depth (HBM gather path)
_MAX_ROWS_PER_STEP_VMEM = 256
_MAX_ROWS_PER_STEP_HBM = 128
_VMEM_LIMIT_CAP = 48 * 1024 * 1024   # headroom below v7x's 64 MiB / TC


def _vmem_capacity_bytes() -> int:
    try:
        return int(pltpu.get_tpu_info().vmem_capacity_bytes)
    except Exception:
        return 64 * 1024 * 1024       # v7x-safe lower bound


def _resident_table_limit_bytes() -> int:
    # The resident-table fast path uses a one-hot MXU gather whose FLOPs grow
    # linearly with n_nodes, so the cap is flop-bound (8 MiB keeps the per-row
    # matmul cheap even on v5e) and never more than 1/4 of physical VMEM.
    return min(8 * 1024 * 1024, _vmem_capacity_bytes() // 4)


# ----------------------------------------------------------------------------
# Kernel A: table single-buffered in VMEM, one-hot MXU gather of R rows/step.
# ----------------------------------------------------------------------------
def _gather_l2norm_vmem_kernel(idx_ref, table_hbm, out_ref, table_vmem, load_sem):
    # idx_ref:    (R, 1) int32 indices for this grid step (VMEM block).
    # table_hbm:  (n_nodes, D) embedding table left in HBM (memory_space=pl.ANY).
    # out_ref:    (R, D) output tile for this grid step.
    # table_vmem: (n_nodes, D) VMEM scratch; copied from HBM ONCE at step 0 and
    #             resident (single-buffered) for all later steps.
    # load_sem:   (1,) DMA semaphore for the one-time table load.
    @pl.when(pl.program_id(0) == 0)
    def _():
        cp = pltpu.make_async_copy(table_hbm, table_vmem, load_sem.at[0])
        cp.start()
        cp.wait()

    n_nodes, d = table_vmem.shape
    r_rows = out_ref.shape[0]
    idx = idx_ref[...]                                        # (R, 1) int32

    # One-hot MXU gather, chunked over the node axis so the one-hot
    # intermediate stays ~R x _ONEHOT_CHUNK regardless of n_nodes.
    prec = jax.lax.Precision.HIGHEST if table_vmem.dtype == jnp.float32 else None
    acc = jnp.zeros((r_rows, d), jnp.float32)
    for c0 in range(0, n_nodes, _ONEHOT_CHUNK):
        csz = min(_ONEHOT_CHUNK, n_nodes - c0)
        local_ids = c0 + jax.lax.broadcasted_iota(jnp.int32, (r_rows, csz), 1)
        onehot = (local_ids == idx).astype(table_vmem.dtype)  # (R, csz)
        acc = acc + jnp.dot(onehot, table_vmem[c0:c0 + csz, :],
                            preferred_element_type=jnp.float32,
                            precision=prec)

    # torch F.normalize: x / max(||x||, 1e-12) == x * rsqrt(max(ssq, 1e-24)).
    ssq = jnp.sum(acc * acc, axis=-1, keepdims=True)          # (R, 1)
    inv = jax.lax.rsqrt(jnp.maximum(ssq, 1e-24))              # EUP
    out_ref[...] = (acc * inv).astype(out_ref.dtype)


# ----------------------------------------------------------------------------
# Kernel B: large-table fallback — 4-deep manual HBM DMA row gather.
# ----------------------------------------------------------------------------
def _gather_l2norm_hbm_kernel(idx_ref, table_hbm, out_ref, buf_ref, sem_ref,
                              *, n_steps, lookahead):
    # idx_ref:   (B_pad,) int32 scalar-prefetch indices in SMEM.
    # table_hbm: (n_nodes, D) embedding table left in HBM (memory_space=pl.ANY).
    # out_ref:   (R, D) output tile for this grid step.
    # buf_ref:   (_NBUF, R, D) VMEM buffers for gathered rows.
    # sem_ref:   (_NBUF,) DMA semaphores (one per buffer slot; each of the R row
    #            copies of a slot signals the same counting semaphore).
    r_rows = out_ref.shape[0]
    step = pl.program_id(0)

    def start_fetch(s, slot):
        # All scalar index reads for step `s` happen here, BEFORE any DMA wait
        # in this grid step (preserves SMEM sst->sld forwarding).
        for r in range(r_rows):
            pltpu.make_async_copy(
                table_hbm.at[pl.ds(idx_ref[s * r_rows + r], 1), :],
                buf_ref.at[slot, pl.ds(r, 1), :],
                sem_ref.at[slot],
            ).start()

    # Prime the pipeline with the first `lookahead` steps (lookahead <= n_steps).
    @pl.when(step == 0)
    def _():
        for k in range(lookahead):
            start_fetch(k, k % _NBUF)

    # Issue the prefetch for step + lookahead into the slot freed at step-1
    # BEFORE waiting on this step's slot, so the new DMAs overlap both the wait
    # and the compute below.
    @pl.when(step + lookahead < n_steps)
    def _():
        start_fetch(step + lookahead, (step + lookahead) % _NBUF)

    slot = step % _NBUF

    # Wait for this step's rows.  The src ref in the descriptor is only used
    # for its shape/byte count (canonical Pallas pattern for waiting on copies
    # issued in an earlier grid step); completion is tracked by sem_ref[slot].
    for r in range(r_rows):
        pltpu.make_async_copy(
            table_hbm.at[pl.ds(0, 1), :],
            buf_ref.at[slot, pl.ds(r, 1), :],
            sem_ref.at[slot],
        ).wait()

    g = buf_ref[slot].astype(jnp.float32)                     # (R, D)
    ssq = jnp.sum(g * g, axis=-1, keepdims=True)
    inv = jax.lax.rsqrt(jnp.maximum(ssq, 1e-24))
    out_ref[...] = (g * inv).astype(out_ref.dtype)


# ----------------------------------------------------------------------------
# Wrapper: gather rows of `table` at `indices` and L2-normalize each row.
# ----------------------------------------------------------------------------
def embed_and_normalize(table: jax.Array, indices: jax.Array,
                        *, rows_per_step: int | None = None,
                        force_hbm_gather: bool = False) -> jax.Array:
    n_nodes, d = table.shape
    (b,) = indices.shape
    indices = indices.astype(jnp.int32)

    itemsize = jnp.dtype(table.dtype).itemsize
    table_bytes = n_nodes * d * itemsize
    use_vmem_table = (not force_hbm_gather) and (
        table_bytes <= _resident_table_limit_bytes())

    cap = _MAX_ROWS_PER_STEP_VMEM if use_vmem_table else _MAX_ROWS_PER_STEP_HBM
    if rows_per_step is None:
        rows_per_step = min(cap, 8 * pl.cdiv(b, 8))
    rows_per_step = max(8, 8 * pl.cdiv(rows_per_step, 8))     # multiple of 8

    b_pad = rows_per_step * pl.cdiv(b, rows_per_step)
    if b_pad != b:
        indices = jnp.concatenate(
            [indices, jnp.zeros((b_pad - b,), jnp.int32)])    # pad with valid id 0
    n_steps = b_pad // rows_per_step

    if use_vmem_table:
        # VMEM budget: single-buffered resident table + double-buffered output
        # tiles + one-hot chunk intermediates + headroom; clamp for v7x.
        need = (table_bytes
                + 4 * rows_per_step * d * 4
                + 4 * rows_per_step * _ONEHOT_CHUNK * 4
                + (4 << 20))
        vmem_limit = int(min(_VMEM_LIMIT_CAP, max(32 << 20, need)))
        idx2d = indices.reshape(b_pad, 1)
        out = pl.pallas_call(
            _gather_l2norm_vmem_kernel,
            out_shape=jax.ShapeDtypeStruct((b_pad, d), table.dtype),
            grid=(n_steps,),
            in_specs=[
                pl.BlockSpec((rows_per_step, 1), lambda i: (i, 0)),  # indices
                pl.BlockSpec(memory_space=pl.ANY),   # table stays in HBM; copied once
            ],
            out_specs=pl.BlockSpec((rows_per_step, d), lambda i: (i, 0)),
            scratch_shapes=[
                pltpu.VMEM((n_nodes, d), table.dtype),   # single-buffered table
                pltpu.SemaphoreType.DMA((1,)),
            ],
            compiler_params=pltpu.CompilerParams(
                # The one-time table load at step 0 requires sequential steps.
                dimension_semantics=("arbitrary",),
                vmem_limit_bytes=vmem_limit,
            ),
        )(idx2d, table)
    else:
        # TODO(synk): sorting / grouping duplicate node ids before the DMA
        # gather (and scattering back) would cut row-DMA count further.
        kernel = functools.partial(
            _gather_l2norm_hbm_kernel,
            n_steps=n_steps,
            lookahead=min(_NBUF - 1, n_steps))
        out = pl.pallas_call(
            kernel,
            out_shape=jax.ShapeDtypeStruct((b_pad, d), table.dtype),
            grid_spec=pltpu.PrefetchScalarGridSpec(
                num_scalar_prefetch=1,
                grid=(n_steps,),
                in_specs=[pl.BlockSpec(memory_space=pl.ANY)],    # raw HBM table
                out_specs=pl.BlockSpec((rows_per_step, d),
                                       lambda i, idx: (i, 0)),
                scratch_shapes=[
                    pltpu.VMEM((_NBUF, rows_per_step, d), table.dtype),
                    pltpu.SemaphoreType.DMA((_NBUF,)),
                ],
            ),
            compiler_params=pltpu.CompilerParams(
                # Manual cross-step pipelining needs sequential execution.
                dimension_semantics=("arbitrary",),
                vmem_limit_bytes=32 << 20,
            ),
        )(indices, table)

    return out[:b] if b_pad != b else out


# ----------------------------------------------------------------------------
# On-device negative sampler: unigram(deg)^0.75, with replacement.
# ----------------------------------------------------------------------------
def sample_negatives(key, deg, num_sampled, distortion=0.75):
    # TODO(synk): the PyTorch module draws fresh np.random samples per call and
    # exposes a `unique` flag; here sampling is with replacement (unique=False,
    # as the module uses) and deterministic given `key`.
    logits = distortion * jnp.log(jnp.asarray(deg, jnp.float32))
    return jax.random.categorical(key, logits, shape=(num_sampled,)).astype(jnp.int32)


# ----------------------------------------------------------------------------
# _PaleEmbedding.forward equivalent (single fused pallas_call over all ids).
# ----------------------------------------------------------------------------
def pale_embedding_forward(table, deg, neg_sample_size, nodes,
                           neighbor_nodes=None, *, rng_key=None,
                           force_hbm_gather=False):
    nodes = jnp.asarray(nodes, jnp.int32)
    if neighbor_nodes is None:
        return embed_and_normalize(table, nodes,
                                   force_hbm_gather=force_hbm_gather)

    neighbor_nodes = jnp.asarray(neighbor_nodes, jnp.int32)
    if rng_key is None:
        rng_key = jax.random.PRNGKey(0)
    neg = sample_negatives(rng_key, deg, neg_sample_size)

    # Fuse all three lookups into one kernel launch over the concatenated ids.
    # TODO(synk): emitting three out_specs from one pallas_call (cumulative
    # offsets) would drop the concat/slice copies around the kernel.
    all_idx = jnp.concatenate([nodes, neighbor_nodes, neg])
    all_out = embed_and_normalize(table, all_idx,
                                  force_hbm_gather=force_hbm_gather)

    b = nodes.shape[0]
    nb = neighbor_nodes.shape[0]
    node_output = all_out[:b]
    neighbor_output = all_out[b:b + nb]
    neg_output = all_out[b + nb:b + nb + neg_sample_size]
    return node_output, neighbor_output, neg_output


# ----------------------------------------------------------------------------
# Pure-JAX reference of the PyTorch semantics.
# ----------------------------------------------------------------------------
def _reference(table, idx):
    g = table[idx].astype(jnp.float32)
    n = jnp.sqrt(jnp.sum(g * g, axis=1, keepdims=True))
    return (g / jnp.maximum(n, 1e-12)).astype(table.dtype)


if __name__ == "__main__":
    # Small, deterministic problem sizes consistent with the module.
    n_nodes = 64
    embedding_dim = 128
    batch = 8
    neg_sample_size = 10

    key = jax.random.PRNGKey(0)
    k_emb, k_nodes, k_nbr, k_deg, k_neg, k_big = jax.random.split(key, 6)

    # nn.Embedding default init: N(0, 1).
    table = jax.random.normal(k_emb, (n_nodes, embedding_dim), dtype=jnp.float32)
    nodes = jax.random.randint(k_nodes, (batch,), 0, n_nodes, dtype=jnp.int32)
    neighbor_nodes = jax.random.randint(k_nbr, (batch,), 0, n_nodes, dtype=jnp.int32)
    deg = jax.random.randint(k_deg, (n_nodes,), 1, 20).astype(jnp.float32)

    # --- fused forward (VMEM-resident one-hot MXU gather fast path) ----------
    node_out, nbr_out, neg_out = pale_embedding_forward(
        table, deg, neg_sample_size, nodes, neighbor_nodes, rng_key=k_neg)
    jax.block_until_ready((node_out, nbr_out, neg_out))

    neg_idx = sample_negatives(k_neg, deg, neg_sample_size)
    np.testing.assert_allclose(np.asarray(node_out),
                               np.asarray(_reference(table, nodes)),
                               rtol=1e-5, atol=1e-5)
    np.testing.assert_allclose(np.asarray(nbr_out),
                               np.asarray(_reference(table, neighbor_nodes)),
                               rtol=1e-5, atol=1e-5)
    np.testing.assert_allclose(np.asarray(neg_out),
                               np.asarray(_reference(table, neg_idx)),
                               rtol=1e-5, atol=1e-5)
    assert node_out.shape == (batch, embedding_dim)
    assert nbr_out.shape == (batch, embedding_dim)
    assert neg_out.shape == (neg_sample_size, embedding_dim)

    # --- nodes-only path ------------------------------------------------------
    only_nodes = pale_embedding_forward(table, deg, neg_sample_size, nodes)
    jax.block_until_ready(only_nodes)
    np.testing.assert_allclose(np.asarray(only_nodes),
                               np.asarray(_reference(table, nodes)),
                               rtol=1e-5, atol=1e-5)

    # --- multi-step / multi-chunk VMEM path (n_nodes > one-hot chunk) ---------
    k_t2, k_i2, k_i3 = jax.random.split(k_big, 3)
    big_nodes = 1200
    table2 = jax.random.normal(k_t2, (big_nodes, embedding_dim), dtype=jnp.float32)
    idx2 = jax.random.randint(k_i2, (40,), 0, big_nodes, dtype=jnp.int32)
    out2 = embed_and_normalize(table2, idx2, rows_per_step=16)
    jax.block_until_ready(out2)
    np.testing.assert_allclose(np.asarray(out2),
                               np.asarray(_reference(table2, idx2)),
                               rtol=1e-5, atol=1e-5)

    # --- large-table fallback (4-deep manual HBM DMA gather, 6 grid steps) ----
    idx3 = jax.random.randint(k_i3, (90,), 0, big_nodes, dtype=jnp.int32)
    out3 = embed_and_normalize(table2, idx3, rows_per_step=16,
                               force_hbm_gather=True)
    jax.block_until_ready(out3)
    np.testing.assert_allclose(np.asarray(out3),
                               np.asarray(_reference(table2, idx3)),
                               rtol=1e-5, atol=1e-5)

    print("KERNEL_OK")
</pallas_src>

<mosaic_0001>
module attributes {stable_mosaic.version = 11 : i64} {
  func.func @_gather_l2norm_vmem_kernel(%arg0: i32, %arg1: memref<32x1xi32, #tpu.memory_space<vmem>>, %arg2: memref<64x128xf32, #tpu.memory_space<any>>, %arg3: memref<32x128xf32, #tpu.memory_space<vmem>>, %arg4: memref<64x128xf32, #tpu.memory_space<vmem>>, %arg5: memref<1x!tpu.dma_semaphore, #tpu.memory_space<semaphore_mem>>) attributes {dimension_semantics = [#tpu.dimension_semantics<arbitrary>], iteration_bounds = array<i64: 1>, scalar_prefetch = 0 : i64, scratch_operands = 2 : i64, tpu.core_type = #tpu.core_type<tc>, window_params = [{transform_indices = @transform_0, window_bounds = array<i64: 32, 1>}, {}, {transform_indices = @transform_2, window_bounds = array<i64: 32, 128>}]} {
    %c0_i32 = arith.constant 0 : i32
    %0 = arith.cmpi eq, %arg0, %c0_i32 : i32
    %1 = arith.extui %0 : i1 to i32
    %c0_i32_0 = arith.constant 0 : i32
    %2 = arith.cmpi ne, %1, %c0_i32_0 : i32
    scf.if %2 {
      %c0_i32_10 = arith.constant 0 : i32
      %24 = tpu.memref_slice %arg5[%c0_i32_10] : memref<1x!tpu.dma_semaphore, #tpu.memory_space<semaphore_mem>> -> memref<1x!tpu.dma_semaphore, #tpu.memory_space<semaphore_mem>>
      %25 = tpu.memref_squeeze %24 : memref<1x!tpu.dma_semaphore, #tpu.memory_space<semaphore_mem>> -> memref<!tpu.dma_semaphore, #tpu.memory_space<semaphore_mem>>
      tpu.enqueue_dma source(%arg2 : memref<64x128xf32, #tpu.memory_space<any>>) target(%arg4 : memref<64x128xf32, #tpu.memory_space<vmem>>) target_semaphore(%25 : memref<!tpu.dma_semaphore, #tpu.memory_space<semaphore_mem>>)
      %c0_i32_11 = arith.constant 0 : i32
      %26 = tpu.memref_slice %arg5[%c0_i32_11] : memref<1x!tpu.dma_semaphore, #tpu.memory_space<semaphore_mem>> -> memref<1x!tpu.dma_semaphore, #tpu.memory_space<semaphore_mem>>
      %27 = tpu.memref_squeeze %26 : memref<1x!tpu.dma_semaphore, #tpu.memory_space<semaphore_mem>> -> memref<!tpu.dma_semaphore, #tpu.memory_space<semaphore_mem>>
      tpu.wait_dma2 semaphore(%27 : memref<!tpu.dma_semaphore, #tpu.memory_space<semaphore_mem>>) src(%arg2 : memref<64x128xf32, #tpu.memory_space<any>>) dst(%arg4 : memref<64x128xf32, #tpu.memory_space<vmem>>)
    } else {
    }
    %c0 = arith.constant 0 : index
    %c0_1 = arith.constant 0 : index
    %3 = vector.load %arg1[%c0, %c0_1] : memref<32x1xi32, #tpu.memory_space<vmem>>, vector<32x1xi32>
    %cst = arith.constant 0.000000e+00 : f32
    %4 = vector.broadcast %cst : f32 to vector<32x128xf32>
    %5 = tpu.iota {dimensions = array<i32: 1>} : vector<32x64xi32>
    %c0_i32_2 = arith.constant 0 : i32
    %6 = vector.broadcast %c0_i32_2 : i32 to vector<32x64xi32>
    %7 = arith.addi %6, %5 : vector<32x64xi32>
    %8 = vector.broadcast %3 : vector<32x1xi32> to vector<32x64xi32>
    %9 = arith.cmpi eq, %7, %8 : vector<32x64xi32>
    %10 = arith.extui %9 : vector<32x64xi1> to vector<32x64xi32>
    %11 = arith.sitofp %10 : vector<32x64xi32> to vector<32x64xf32>
    %c0_3 = arith.constant 0 : index
    %c0_4 = arith.constant 0 : index
    %12 = vector.load %arg4[%c0_3, %c0_4] : memref<64x128xf32, #tpu.memory_space<vmem>>, vector<64x128xf32>
    %cst_5 = arith.constant dense<0.000000e+00> : vector<32x128xf32>
    %13 = tpu.matmul %11, %12, %cst_5 {dimension_numbers = #tpu.dot_dimension_numbers<[1], [0], [0], [1], [0, 0, 1, 1], [], []>, precision = #tpu.contract_precision<fp32>} : vector<32x64xf32>, vector<64x128xf32>, vector<32x128xf32> -> vector<32x128xf32>
    %14 = arith.addf %4, %13 : vector<32x128xf32>
    %15 = arith.mulf %14, %14 : vector<32x128xf32>
    %cst_6 = arith.constant dense<0.000000e+00> : vector<32xf32>
    %16 = vector.multi_reduction <add>, %15, %cst_6 [1] : vector<32x128xf32> to vector<32xf32>
    %17 = vector.shape_cast %16 : vector<32xf32> to vector<32x1xf32>
    %cst_7 = arith.constant 1.000000e-24 : f32
    %18 = vector.broadcast %cst_7 : f32 to vector<32x1xf32>
    %19 = arith.maximumf %17, %18 : vector<32x1xf32>
    %20 = math.rsqrt %19 : vector<32x1xf32>
    %21 = vector.broadcast %20 : vector<32x1xf32> to vector<32x128xf32>
    %22 = arith.mulf %14, %21 : vector<32x128xf32>
    %c0_8 = arith.constant 0 : index
    %c0_9 = arith.constant 0 : index
    %23 = vector.load %arg3[%c0_8, %c0_9] : memref<32x128xf32, #tpu.memory_space<vmem>>, vector<32x128xf32>
    tpu.vector_store %arg3[%c0_8, %c0_9], %22 {strides = array<i32>} : memref<32x128xf32, #tpu.memory_space<vmem>>, vector<32x128xf32>,
    return
  }
  func.func @transform_0(%arg0: i32) -> (i32, i32) {
    %c0_i32 = arith.constant 0 : i32
    %c0_i32_0 = arith.constant 0 : i32
    return %arg0, %c0_i32 : i32, i32
  }
  func.func @transform_2(%arg0: i32) -> (i32, i32) {
    %c0_i32 = arith.constant 0 : i32
    %c0_i32_0 = arith.constant 0 : i32
    return %arg0, %c0_i32 : i32, i32
  }
}

</mosaic_0001>

<bundles_post_ra>
// kernel: tpu_custom_call.1
= control target key start
LH: loop header
LB: loop body
LE: loop exit
PB: predicated region body
PF: predicated region fallthrough
CT: control target
= control target key end

     0   :  { %7 = vsyncpa [#allocation5], 0  ;;  %s1076_s9 = smov [#allocation2]   ;;  %s1330_s0 = inlined_call_operand.vmem [shape: s32[32,1], index: 0, kind: input, shape index: {}]   ;;  %s1331_s1 = inlined_call_operand.hbm [shape: f32[64,128], index: 1, kind: input, shape index: {}]   ;;  %s1332_s2 = inlined_call_operand.hbm [shape: f32[32,128], index: 2, kind: output, shape index: {}]  }
   0x1   :  { %s21_s10 = sshll.u32 %s1076_s9, 4  ;;  %s22_s10 = int_to_ptr.vmem [resolvable:$true] %s21_s10 }
   0x2   :  { %s1040_s11 = scalar_lea.vmem %s22_s10, 1024  ;;  %p1045_p1 = scmp.lt.s32.totalorder %s22_s10, %s22_s10 }
   0x3   :  { %p1041_p0 = scmp.ne.s32.totalorder %s22_s10, %s1040_s11  ;;  %p1046_p2 = scmp.lt.s32.totalorder %s1040_s11, %s1040_s11 }
   0x5   :  { %p1047_p3 = por %p1046_p2, %p1045_p1 }
   0x7   :  { %p1048_p4 = pnand %p1047_p3, %p1041_p0 }
   0x9   :  { %1051 = shalt.err (!%p1048_p4)  }
   0xa   :  { %24 = dma.hbm_to_vmem [thread:$0]  %s1331_s1, 1024, %s22_s10, [#allocation3] }
   0xb   :  { %1072 = dma.done.wait [#allocation3], 1024 }
   0xc   :  { %1073 = vsyncadd [#allocation3], 4294966272  ;;  %v1077_v0 = vmov 0   ;;  %v28_v1 = vld [vmem:[%s1330_s0] sm:$0xff]  ;;  %v30_v2 = vld [vmem:[%s1330_s0 + $0x10] sm:$0xff]  ;;  %v32_v53 = vlaneseq  ;;  %vm66_vm0 = vcmask 523264  }
   0xd   :  { %1022 = vset.pattern.permute.xlu0 %v1077_v0  ;;  %1023 = vset.pattern.permute.xlu1 %v1077_v0  ;;  %v29_v3 = vld [vmem:[%s1330_s0 + $0x8] sm:$0xff]  ;;  %v31_v4 = vld [vmem:[%s1330_s0 + $0x18] sm:$0xff]  ;;  %v64_v6 = vld [vmem:[#allocation2 + $0x30] sm:$0xff]  ;;  %v1078_v57 = vmov 0.0   ;;  %s1079_s0 = smov [#allocation4]  }
   0xe   :  { %35 = vperm.xlu0 %1022, %v28_v1   ;;  %41 = vperm.xlu1 %1023, %v30_v2   ;;  %v65_v5 = vld [vmem:[#allocation2 + $0x38] sm:$0xff]  ;;  %v1114_v8 = vand.u32 4294901760, %v64_v6  ;;  %v63_v9 = vld [vmem:[#allocation2 + $0x28] sm:$0xff]  ;;  %v62_v10 = vld [vmem:[#allocation2 + $0x20] sm:$0xff]  ;;  %v33_v54 = vand.u32 127, %v32_v53  ;;  %s778_s21 = sshll.u32 %s1079_s0, 4  ;;  %s779_s21 = int_to_ptr.vmem [resolvable:$true] %s778_s21 }
   0xf   :  { %v1112_v7 = vand.u32 4294901760, %v65_v5  ;;  %v61_v11 = vld [vmem:[#allocation2 + $0x18] sm:$0xff]  ;;  %v1116_v12 = vand.u32 4294901760, %v63_v9  ;;  %v1118_v13 = vand.u32 4294901760, %v62_v10  ;;  %v60_v15 = vld [vmem:[#allocation2 + $0x10] sm:$0xff]  ;;  %v59_v16 = vld [vmem:[#allocation2 + $0x8] sm:$0xff]  ;;  %p1057_p6 = scmp.lt.s32.totalorder %s779_s21, %s779_s21 }
  0x10   :  { %v1120_v14 = vand.u32 4294901760, %v61_v11  ;;  %v58_v17 = vld [vmem:[#allocation2] sm:$0xff]  ;;  %v1126_v19 = vsub.f32 %v64_v6, %v1114_v8  ;;  %v1129_v20 = vand.u32 4294901760, %v60_v15  ;;  %v1131_v21 = vand.u32 4294901760, %v59_v16  ;;  %s1052_s22 = scalar_lea.vmem %s779_s21, 512 }
  0x11   :  { %v1123_v18 = vsub.f32 %v65_v5, %v1112_v7  ;;  %884 = vmatprep.subr.mxu0 %v1112_v7  ;;  %v1134_v22 = vsub.f32 %v63_v9, %v1116_v12  ;;  %v1137_v23 = vsub.f32 %v62_v10, %v1118_v13  ;;  %v1142_v25 = vand.u32 4294901760, %v58_v17  ;;  %p1053_p5 = scmp.ne.s32.totalorder %s779_s21, %s1052_s22  ;;  %p1058_p7 = scmp.lt.s32.totalorder %s1052_s22, %s1052_s22 }
  0x12   :  { %38 = vperm.xlu0 %1022, %v29_v3   ;;  %44 = vperm.xlu1 %1023, %v31_v4   ;;  %v1140_v24 = vsub.f32 %v61_v11, %v1120_v14  ;;  %v1148_v27 = vand.u32 4294901760, %v1126_v19  ;;  %v1152_v28 = vsub.f32 %v60_v15, %v1129_v20  ;;  %v1170_v34 = vsub.f32 %v59_v16, %v1131_v21 }
  0x13   :  { %v1145_v26 = vand.u32 4294901760, %v1123_v18  ;;  %885 = vmatpush3.msra.mxu0 %v1112_v7  ;;  %v1155_v29 = vand.u32 4294901760, %v1134_v22  ;;  %v1158_v30 = vand.u32 4294901760, %v1137_v23  ;;  %v1176_v36 = vsub.f32 %v58_v17, %v1142_v25  ;;  %p1059_p8 = por %p1058_p7, %p1057_p6 }
  0x14   :  { %886 = vmatprep.subr.mxu0 %v1114_v8  ;;  %v219_v32 = vsub.f32 %v1126_v19, %v1148_v27  ;;  %v1166_v33 = vand.u32 4294901760, %v1140_v24  ;;  %v1181_v40 = vand.u32 4294901760, %v1152_v28  ;;  %v1188_v43 = vand.u32 4294901760, %v1170_v34 }
  0x15   :  { %v212_v31 = vsub.f32 %v1123_v18, %v1145_v26  ;;  %887 = vmatpush3.msra.mxu0 %v1114_v8  ;;  %v226_v35 = vsub.f32 %v1134_v22, %v1155_v29  ;;  %v233_v39 = vsub.f32 %v1137_v23, %v1158_v30  ;;  %v1195_v46 = vand.u32 4294901760, %v1176_v36  ;;  %p1060_p9 = pnand %p1059_p8, %p1053_p5 }
  0x16   :  { %888 = vmatprep.subr.mxu0 %v1116_v12  ;;  %v220_v38 = vand.u32 4294901760, %v219_v32  ;;  %v240_v42 = vsub.f32 %v1140_v24, %v1166_v33  ;;  %v247_v45 = vsub.f32 %v1152_v28, %v1181_v40  ;;  %v254_v48 = vsub.f32 %v1170_v34, %v1188_v43 }
  0x17   :  { %v213_v37 = vand.u32 4294901760, %v212_v31  ;;  %889 = vmatpush3.msra.mxu0 %v1116_v12  ;;  %v227_v41 = vand.u32 4294901760, %v226_v35  ;;  %v234_v44 = vand.u32 4294901760, %v233_v39  ;;  %v261_v50 = vsub.f32 %v1176_v36, %v1195_v46 }
  0x18   :  { %890 = vmatprep.subr.mxu0 %v1118_v13  ;;  %v241_v47 = vand.u32 4294901760, %v240_v42  ;;  %v248_v49 = vand.u32 4294901760, %v247_v45  ;;  %v255_v51 = vand.u32 4294901760, %v254_v48 }
  0x19   :  { %906 = vmatprep.subr.mxu1 %v213_v37  ;;  %891 = vmatpush3.msra.mxu0 %v1118_v13  ;;  %v262_v52 = vand.u32 4294901760, %v261_v50 }
  0x1a   :  { %907 = vmatpush3.msra.mxu1 %v213_v37  ;;  %892 = vmatprep.subr.mxu0 %v1120_v14 }
  0x1b   :  { %908 = vmatprep.subr.mxu1 %v220_v38  ;;  %893 = vmatpush3.msra.mxu0 %v1120_v14 }
  0x1c   :  { %909 = vmatpush3.msra.mxu1 %v220_v38  ;;  %894 = vmatprep.subr.mxu0 %v1129_v20 }
  0x1d   :  { %910 = vmatprep.subr.mxu1 %v227_v41  ;;  %895 = vmatpush3.msra.mxu0 %v1129_v20 }
  0x1e   :  { %911 = vmatpush3.msra.mxu1 %v227_v41  ;;  %896 = vmatprep.subr.mxu0 %v1131_v21 }
  0x1f   :  { %912 = vmatprep.subr.mxu1 %v234_v44  ;;  %897 = vmatpush3.msra.mxu0 %v1131_v21 }
  0x20   :  { %913 = vmatpush3.msra.mxu1 %v234_v44  ;;  %898 = vmatprep.subr.mxu0 %v1142_v25 }
  0x21   :  { %914 = vmatprep.subr.mxu1 %v241_v47  ;;  %899 = vmatpush3.msra.mxu0 %v1142_v25 }
  0x22   :  { %915 = vmatpush3.msra.mxu1 %v241_v47  ;;  %928 = vmatprep.subr.mxu0 %v1123_v18 }
  0x23   :  { %916 = vmatprep.subr.mxu1 %v248_v49 }
  0x24   :  { %917 = vmatpush3.msra.mxu1 %v248_v49 }
  0x25   :  { %918 = vmatprep.subr.mxu1 %v255_v51 }
  0x26   :  { %919 = vmatpush3.msra.mxu1 %v255_v51 }
  0x27   :  { %920 = vmatprep.subr.mxu1 %v262_v52 }
  0x28   :  { %921 = vmatpush3.msra.mxu1 %v262_v52 }
  0x29   :  { %950 = vmatprep.subr.mxu1 %v1112_v7 }
  0x89   :  { %v36_v55 = vpop.permute.xlu0 %35  ;;  %v42_v56 = vpop.permute.xlu1 %41 }
  0x8a   :  { %vm46_vm1 = vcmp.eq.s32.totalorder %v33_v54, %v36_v55  ;;  %vm48_vm2 = vcmp.eq.s32.totalorder %v33_v54, %v42_v56 }
  0x8b   :  { %v1210_v58 = vsel %vm46_vm1, 1.0, %v1078_v57  ;;  %v1212_v59 = vsel %vm48_vm2, 1.0, %v1078_v57 }
  0x8c   :  { %922 = vmatprep.mubr.msk.f32.mxu1 %vm66_vm0, %v1210_v58  ;;  %v74_v60 = vsel %vm66_vm0, %v1212_v59, 0  ;;  %v68_v61 = vsel %vm66_vm0, %v1210_v58, 0 }
  0x8d   :  { %v1220_v62 = vsub.f32 %v74_v60, %v74_v60  ;;  %v39_v63 = vpop.permute.xlu0 %38  ;;  %v45_v0 = vpop.permute.xlu1 %44  ;;  %v153_v1 = vsub.f32 %v68_v61, %v68_v61 }
  0x8e   :  { %vm47_vm3 = vcmp.eq.s32.totalorder %v33_v54, %v39_v63  ;;  %vm49_vm4 = vcmp.eq.s32.totalorder %v33_v54, %v45_v0 }
  0x8f   :  { %v1222_v2 = vsel %vm47_vm3, 1.0, %v1078_v57  ;;  %v1224_v3 = vsel %vm49_vm4, 1.0, %v1078_v57  ;;  %v154_v4 = vand.u32 4294901760, %v153_v1  ;;  %v174_v15 = vand.u32 4294901760, %v1220_v62 }
  0x90   :  { %v71_v5 = vsel %vm66_vm0, %v1222_v2, 0  ;;  %923 = vmatmul.mubr.msk.f32.vlgmr.msra.gmra.mxu1 %vm66_vm0, %v1222_v2  ;;  %v77_v6 = vsel %vm66_vm0, %v1224_v3, 0 }
  0x91   :  { %v1232_v9 = vsub.f32 %v71_v5, %v71_v5  ;;  %951 = vmatpush3.msra.mxu1 %v1112_v7  ;;  %v1235_v10 = vsub.f32 %v77_v6, %v77_v6  ;;  %925 = vmatprep.mubr.msk.f32.mxu1 %vm66_vm0, %v1212_v59  ;;  %v155_v11 = vsub.f32 %v153_v1, %v154_v4 }
  0x92   :  { %952 = vmatprep.subr.mxu1 %v1114_v8  ;;  %v175_v35 = vsub.f32 %v1220_v62, %v174_v15 }
  0x93   :  { %953 = vmatpush3.msra.mxu1 %v1114_v8  ;;  %v156_v16 = vand.u32 4294901760, %v155_v11  ;;  %v164_v17 = vand.u32 4294901760, %v1232_v9  ;;  %v184_v31 = vand.u32 4294901760, %v1235_v10 }
  0x94   :  { %954 = vmatprep.subr.mxu1 %v1116_v12  ;;  %926 = vmatmul.mubr.msk.f32.gmra.mxu1 %vm66_vm0, %v1224_v3  ;;  %v176_v39 = vand.u32 4294901760, %v175_v35 }
  0x95   :  { %955 = vmatpush3.msra.mxu1 %v1116_v12  ;;  %900 = vmatprep.mubr.f32.mxu0 %v156_v16  ;;  %v165_v32 = vsub.f32 %v1232_v9, %v164_v17  ;;  %v185_v37 = vsub.f32 %v1235_v10, %v184_v31 }
  0x96   :  { %956 = vmatprep.subr.mxu1 %v1118_v13  ;;  %966 = vmatprep.mubr.f32.mxu1 %v154_v4 }
  0x97   :  { %957 = vmatpush3.msra.mxu1 %v1118_v13  ;;  %v166_v38 = vand.u32 4294901760, %v165_v32  ;;  %v186_v41 = vand.u32 4294901760, %v185_v37 }
  0x98   :  { %958 = vmatprep.subr.mxu1 %v1120_v14 }
  0x99   :  { %959 = vmatpush3.msra.mxu1 %v1120_v14  ;;  %901 = vmatmul.mubr.f32.vlgmr.msra.gmra.mxu0 %v166_v38 }
  0x9a   :  { %929 = vmatpush3.msra.mxu0 %v1123_v18  ;;  %960 = vmatprep.subr.mxu1 %v1129_v20 }
  0x9b   :  { %930 = vmatprep.subr.mxu0 %v1126_v19  ;;  %961 = vmatpush3.msra.mxu1 %v1129_v20 }
  0x9c   :  { %931 = vmatpush3.msra.mxu0 %v1126_v19  ;;  %962 = vmatprep.subr.mxu1 %v1131_v21 }
  0x9d   :  { %903 = vmatprep.mubr.f32.mxu0 %v176_v39  ;;  %932 = vmatprep.subr.mxu0 %v1134_v22 }
  0x9e   :  { %963 = vmatpush3.msra.mxu1 %v1131_v21  ;;  %904 = vmatmul.mubr.f32.gmra.mxu0 %v186_v41 }
  0x9f   :  { %933 = vmatpush3.msra.mxu0 %v1134_v22  ;;  %964 = vmatprep.subr.mxu1 %v1142_v25 }
  0xa0   :  { %934 = vmatprep.subr.mxu0 %v1137_v23  ;;  %944 = vmatprep.mubr.f32.mxu0 %v153_v1 }
  0xa1   :  { %965 = vmatpush3.msra.mxu1 %v1142_v25  ;;  %935 = vmatpush3.msra.mxu0 %v1137_v23 }
  0xa2   :  { %967 = vmatmul.mubr.f32.vlgmr.msra.gmra.mxu1 %v164_v17  ;;  %994 = vmatprep.subr.mxu1 %v1112_v7 }
  0xa3   :  { %936 = vmatprep.subr.mxu0 %v1140_v24  ;;  %969 = vmatprep.mubr.f32.mxu1 %v174_v15 }
  0xa4   :  { %995 = vmatpush3.msra.mxu1 %v1112_v7  ;;  %937 = vmatpush3.msra.mxu0 %v1140_v24 }
  0xa5   :  { %996 = vmatprep.subr.mxu1 %v1114_v8  ;;  %938 = vmatprep.subr.mxu0 %v1152_v28 }
  0xa6   :  { %997 = vmatpush3.msra.mxu1 %v1114_v8  ;;  %939 = vmatpush3.msra.mxu0 %v1152_v28 }
  0xa7   :  { %970 = vmatmul.mubr.f32.gmra.mxu1 %v184_v31  ;;  %998 = vmatprep.subr.mxu1 %v1116_v12 }
  0xa8   :  { %940 = vmatprep.subr.mxu0 %v1170_v34  ;;  %999 = vmatpush3.msra.mxu1 %v1116_v12 }
  0xa9   :  { %1010 = vmatprep.mubr.msk.f32.mxu1 %vm66_vm0, %v1210_v58  ;;  %941 = vmatpush3.msra.mxu0 %v1170_v34 }
  0xaa   :  { %1000 = vmatprep.subr.mxu1 %v1118_v13  ;;  %942 = vmatprep.subr.mxu0 %v1176_v36 }
  0xab   :  { %1001 = vmatpush3.msra.mxu1 %v1118_v13  ;;  %943 = vmatpush3.msra.mxu0 %v1176_v36 }
  0xac   :  { %1002 = vmatprep.subr.mxu1 %v1120_v14  ;;  %945 = vmatmul.mubr.f32.vlgmr.msra.gmra.mxu0 %v1232_v9 }
  0xad   :  { %972 = vmatprep.subr.mxu0 %v1145_v26  ;;  %1003 = vmatpush3.msra.mxu1 %v1120_v14 }
  0xae   :  { %947 = vmatprep.mubr.f32.mxu0 %v1220_v62  ;;  %973 = vmatpush3.msra.mxu0 %v1145_v26 }
  0xaf   :  { %1004 = vmatprep.subr.mxu1 %v1129_v20  ;;  %974 = vmatprep.subr.mxu0 %v1148_v27 }
  0xb0   :  { %1005 = vmatpush3.msra.mxu1 %v1129_v20  ;;  %975 = vmatpush3.msra.mxu0 %v1148_v27 }
  0xb1   :  { %1006 = vmatprep.subr.mxu1 %v1131_v21  ;;  %948 = vmatmul.mubr.f32.gmra.mxu0 %v1235_v10 }
  0xb2   :  { %976 = vmatprep.subr.mxu0 %v1155_v29  ;;  %1007 = vmatpush3.msra.mxu1 %v1131_v21 }
  0xb3   :  { %977 = vmatpush3.msra.mxu0 %v1155_v29  ;;  %988 = vmatprep.mubr.msk.f32.mxu0 %vm66_vm0, %v1210_v58 }
  0xb4   :  { %1008 = vmatprep.subr.mxu1 %v1142_v25  ;;  %978 = vmatprep.subr.mxu0 %v1158_v30 }
  0xb5   :  { %1009 = vmatpush3.msra.mxu1 %v1142_v25  ;;  %979 = vmatpush3.msra.mxu0 %v1158_v30 }
  0xb6   :  { %1011 = vmatmul.mubr.msk.f32.vlgmr.msra.gmra.mxu1 %vm66_vm0, %v1222_v2  ;;  %980 = vmatprep.subr.mxu0 %v1166_v33 }
  0xb7   :  { %1013 = vmatprep.mubr.msk.f32.mxu1 %vm66_vm0, %v1212_v59  ;;  %981 = vmatpush3.msra.mxu0 %v1166_v33 }
  0xb8   :  { %982 = vmatprep.subr.mxu0 %v1181_v40 }
  0xb9   :  { %983 = vmatpush3.msra.mxu0 %v1181_v40 }
  0xba   :  { %1014 = vmatmul.mubr.msk.f32.gmra.mxu1 %vm66_vm0, %v1224_v3  ;;  %984 = vmatprep.subr.mxu0 %v1188_v43 }
  0xbb   :  { %985 = vmatpush3.msra.mxu0 %v1188_v43 }
  0xbc   :  { %986 = vmatprep.subr.mxu0 %v1195_v46 }
  0xbd   :  { %987 = vmatpush3.msra.mxu0 %v1195_v46 }
  0xbe   :  { %989 = vmatmul.mubr.msk.f32.vlgmr.msra.gmra.mxu0 %vm66_vm0, %v1222_v2 }
  0xbf   :  { %991 = vmatprep.mubr.msk.f32.mxu0 %vm66_vm0, %v1212_v59 }
  0xc2   :  { %992 = vmatmul.mubr.msk.f32.gmra.mxu0 %vm66_vm0, %v1224_v3 }
 0x150   :  { %v924_v7 = vpop.f32.mrf.mxu1 }
 0x152   :  { %v299_v12 = vpop.f32.mrf.mxu1 }
 0x154   :  { %v927_v13 = vpop.f32.mrf.mxu1 }
 0x156   :  { %v311_v18 = vpop.f32.mrf.mxu1 }
 0x159   :  { %v902_v8 = vpop.f32.mrf.mxu0 }
 0x15a   :  { %v306_v26 = vadd.f32 %v924_v7, %v902_v8 }
 0x15b   :  { %v158_v14 = vpop.f32.mrf.mxu0 }
 0x15c   :  { %v300_v29 = vadd.f32 %v299_v12, %v158_v14 }
 0x15e   :  { %v905_v19 = vpop.f32.mrf.mxu0 }
 0x15f   :  { %v318_v40 = vadd.f32 %v927_v13, %v905_v19 }
 0x160   :  { %v178_v21 = vpop.f32.mrf.mxu0 }
 0x161   :  { %v312_v42 = vadd.f32 %v311_v18, %v178_v21 }
 0x162   :  { %v968_v20 = vpop.f32.mrf.mxu1 }
 0x164   :  { %v507_v22 = vpop.f32.mrf.mxu1 }
 0x167   :  { %v971_v24 = vpop.f32.mrf.mxu1 }
 0x169   :  { %v523_v27 = vpop.f32.mrf.mxu1 }
 0x16c   :  { %v946_v23 = vpop.f32.mrf.mxu0 }
 0x16d   :  { %v413_v30 = vadd.f32 %v946_v23, %v306_v26 }
 0x16e   :  { %v405_v25 = vpop.f32.mrf.mxu0 }
 0x16f   :  { %v406_v34 = vadd.f32 %v405_v25, %v300_v29  ;;  %v516_v43 = vadd.f32 %v968_v20, %v413_v30 }
 0x171   :  { %v949_v28 = vpop.f32.mrf.mxu0  ;;  %v508_v49 = vadd.f32 %v507_v22, %v406_v34 }
 0x172   :  { %v427_v46 = vadd.f32 %v949_v28, %v318_v40 }
 0x173   :  { %v419_v36 = vpop.f32.mrf.mxu0 }
 0x174   :  { %v420_v47 = vadd.f32 %v419_v36, %v312_v42  ;;  %v532_v56 = vadd.f32 %v971_v24, %v427_v46 }
 0x176   :  { %v1012_v33 = vpop.f32.mrf.mxu1  ;;  %v524_v57 = vadd.f32 %v523_v27, %v420_v47 }
 0x178   :  { %v723_v44 = vpop.f32.mrf.mxu1 }
 0x17a   :  { %v1015_v53 = vpop.f32.mrf.mxu1 }
 0x17c   :  { %v735_v63 = vpop.f32.mrf.mxu1 }
 0x17e   :  { %v990_v45 = vpop.f32.mrf.mxu0 }
 0x17f   :  { %v633_v48 = vadd.f32 %v990_v45, %v516_v43 }
 0x180   :  { %v626_v50 = vpop.f32.mrf.mxu0 }
 0x181   :  { %v730_v51 = vadd.f32 %v1012_v33, %v633_v48  ;;  %v627_v52 = vadd.f32 %v626_v50, %v508_v49 }
 0x182   :  { %v993_v54 = vpop.f32.mrf.mxu0 }
 0x183   :  { %v724_v55 = vadd.f32 %v723_v44, %v627_v52  ;;  %v746_v58 = vmul.f32 %v730_v51, %v730_v51  ;;  %v645_v60 = vadd.f32 %v993_v54, %v532_v56 }
 0x184   :  { %v638_v59 = vpop.f32.mrf.mxu0 }
 0x185   :  { %v639_v61 = vadd.f32 %v638_v59, %v524_v57  ;;  %751 = vadd.xlane.f32.xlu1 %v746_v58  ;;  %v745_v62 = vmul.f32 %v724_v55, %v724_v55  ;;  %v742_v1 = vadd.f32 %v1015_v53, %v645_v60 }
 0x187   :  { %v736_v0 = vadd.f32 %v735_v63, %v639_v61  ;;  %749 = vadd.xlane.f32.xlu0 %v745_v62  ;;  %v748_v3 = vmul.f32 %v742_v1, %v742_v1 }
 0x189   :  { %v747_v2 = vmul.f32 %v736_v0, %v736_v0 }
 0x18b   :  { %753 = vadd.xlane.f32.xlu0 %v747_v2 }
 0x18f   :  { %755 = vadd.xlane.f32.xlu0 %v748_v3 }
 0x20e   :  { %v752_v4 = vpop.xlane.xlu1 %751 }
 0x20f   :  { %v758_v5 = vmax.f32 %v752_v4, 1e-24 }
 0x210   :  { %v750_v6 = vpop.xlane.xlu0 %749 }
 0x211   :  { %1024 = vrsqrt.f32 %v758_v5  ;;  %v757_v9 = vmax.f32 %v750_v6, 1e-24 }
 0x213   :  { %1026 = vrsqrt.f32 %v757_v9 }
 0x214   :  { %v754_v10 = vpop.xlane.xlu0 %753 }
 0x215   :  { %v759_v11 = vmax.f32 %v754_v10, 1e-24 }
 0x217   :  { %1028 = vrsqrt.f32 %v759_v11 }
 0x218   :  { %v756_v15 = vpop.xlane.xlu0 %755 }
 0x219   :  { %v760_v16 = vmax.f32 %v756_v15, 1e-24 }
 0x21b   :  { %1030 = vrsqrt.f32 %v760_v16 }
 0x21e   :  { %v1025_v17 = vpop.eup %1024 }
 0x21f   :  { %v766_v31 = vmul.f32 %v1025_v17, %v730_v51 }
 0x220   :  { %v1027_v32 = vpop.eup %1026 }
 0x221   :  { %770 = vst [vmem:[#allocation4 + $0x8] sm:$0xff] %v766_v31  ;;  %v765_v35 = vmul.f32 %v1027_v32, %v724_v55 }
 0x223   :  { %769 = vst [vmem:[#allocation4] sm:$0xff] %v765_v35 }
 0x224   :  { %v1029_v37 = vpop.eup %1028 }
 0x225   :  { %v767_v38 = vmul.f32 %v1029_v37, %v736_v0 }
 0x227   :  { %771 = vst [vmem:[#allocation4 + $0x10] sm:$0xff] %v767_v38 }
 0x228   :  { %v1031_v39 = vpop.eup %1030 }
 0x229   :  { %v768_v41 = vmul.f32 %v1031_v39, %v742_v1 }
 0x22b   :  { %772 = vst [vmem:[#allocation4 + $0x18] sm:$0xff] %v768_v41 }
 0x22c   :  { %1063 = shalt.err (!%p1060_p9)
}
 0x22d   :  { %s1080_s23 = smov 128   ;;  %s1081_s24 = smov 8  }
 0x22e   :  { %784 = dma.vmem_to_hbm [thread:$0]  %s779_s21, 512, %s1332_s2, [#allocation5], %s1080_s23, %s1080_s23, %s1081_s24  }
 0x22f   :  { %1074 = dma.done.wait [#allocation5], 512  }
 0x230   :  { %1075 = vsyncadd [#allocation5], 4294966784 }
 0x231   :  { %788 = vsyncpa [#allocation5], 1 }
 0x232   :  { %789 = vsyncmov [#allocation3] }
 0x235   :  { %s790_s27 = vpop.sfrf %789 }
 0x236   :  { %p811_p10 = scmp.ne.s32.totalorder %s790_s27, 0 }
 0x238   :  { %794 = shalt.err (%p811_p10)  }

</bundles_post_ra>
